<compile_context>
chip_gen: v7x
topology: tpu7x:2x2x1
jax: 0.10.0
libtpu: 0.0.40
codegen_flags: <defaults>
</compile_context>

<pallas_src>
import functools

import jax
import jax.numpy as jnp
from jax.experimental import pallas as pl
from jax.experimental.pallas import tpu as pltpu


def _fasttext_kernel(x_ref, w1_ref, b1_ref, w2_ref, b2_ref, o_ref, pooled_ref):
    # x_ref:  (tm, S, E)          w1_ref: (2*seg, Hp)   b1_ref: (1, Hp)
    # w2_ref: (Hp, Lp)            b2_ref: (1, Lp)       o_ref:  (tm, Lp)
    # pooled_ref: (tm, 2*seg) f32 scratch, seg = round_up(S, 128)
    x = x_ref[...]
    S = x.shape[1]
    seg = pooled_ref.shape[1] // 2

    # MaxPool1d(kernel=E) / AvgPool1d(kernel=E) over the embedding axis.
    mx = jnp.max(x, axis=-1)                                  # (tm, S)
    av = jnp.mean(x.astype(jnp.float32), axis=-1)             # (tm, S), f32 acc

    # Build the merged mid_dense operand: concat([mx, av]) lives at lane
    # offsets 0 and seg (=128) of the scratch; every other lane is zeroed and
    # lines up with a zero row of the merged W1, so ONE K=2*seg matmul
    # computes mx @ W1_top + av @ W1_bot.
    pooled_ref[...] = jnp.zeros_like(pooled_ref)
    pooled_ref[:, :S] = mx.astype(jnp.float32)
    pooled_ref[:, seg:seg + S] = av

    p = pooled_ref[...].astype(w1_ref.dtype)
    h = jnp.dot(p, w1_ref[...], preferred_element_type=jnp.float32) + b1_ref[...]
    t = jnp.tanh(h)                                           # EUP transcendental

    logits = jnp.dot(t.astype(w2_ref.dtype), w2_ref[...],
                     preferred_element_type=jnp.float32) + b2_ref[...]

    # Softmax over the (padded) label axis; padded columns carry a -1e30 bias
    # so exp() underflows to exactly 0 there.
    m = jnp.max(logits, axis=-1, keepdims=True)
    e = jnp.exp(logits - m)
    s = jnp.sum(e, axis=-1, keepdims=True)
    inv = pl.reciprocal(s, approx=True)      # EUP rcp, off the VALU
    inv = inv * (2.0 - s * inv)              # one Newton step -> ~f32-exact
    o_ref[...] = (e * inv).astype(o_ref.dtype)


def _round_up(v, m):
    return (v + m - 1) // m * m


@functools.partial(jax.jit, static_argnames=("tm",))
def fasttext_forward(x, w1, b1, w2, b2, *, tm=2048):
    """FastText forward pass.

    x:  (batch, seq_len, embedding_size)
    w1: (2*seq_len, hidden)   b1: (hidden,)      (mid_dense, weight pre-transposed)
    w2: (hidden, label_size)  b2: (label_size,)  (output_dense, pre-transposed)
    Returns (batch, label_size) softmax probabilities.
    """
    B, S, E = x.shape
    H = w1.shape[1]
    L = w2.shape[1]
    assert w1.shape[0] == 2 * S, "mid_dense expects in_features == 2*seq_len"

    # Lane-dense feature padding: 128 minimum, 256 once large (v6e/v7x MXU width).
    def _feat_pad(n):
        return _round_up(n, 128) if n <= 128 else _round_up(n, 256)

    Hp = _feat_pad(H)
    Lp = _feat_pad(L)
    seg = _round_up(S, 128)          # lane-aligned slot for each pooled half
    Kp = 2 * seg

    # Row tiling: clamp to the 8-aligned batch; with >=16 rows cap the tile at
    # half the batch so the "parallel" grid has >=2 steps (both v7x TCs busy).
    B8 = _round_up(B, 8)
    tm_eff = min(tm, B8)
    if B8 >= 16:
        tm_eff = min(tm_eff, max(8, _round_up(B8 // 2, 8)))
    Bp = _round_up(B8, tm_eff)

    xp = jnp.pad(x, ((0, Bp - B), (0, 0), (0, 0)))
    # Merged mid_dense weight: rows [0:S] = max-pool half, rows [seg:seg+S] =
    # avg-pool half, all other rows zero (matches the pooled scratch layout).
    w1p = jnp.zeros((Kp, Hp), dtype=w1.dtype)
    w1p = w1p.at[:S, :H].set(w1[:S])
    w1p = w1p.at[seg:seg + S, :H].set(w1[S:])
    b1p = jnp.pad(b1, (0, Hp - H)).reshape(1, Hp)
    w2p = jnp.pad(w2, ((0, Hp - H), (0, Lp - L)))
    # -1e30 bias on padded label columns -> masked out of the softmax exactly
    # (kept in f32; would need care if logits ever move to fp16).
    pad_mask = jnp.full((Lp,), -1e30, dtype=jnp.float32).at[:L].set(0.0)
    b2p = (jnp.pad(b2.astype(jnp.float32), (0, Lp - L)) + pad_mask).reshape(1, Lp)

    grid = (Bp // tm_eff,)

    # VMEM budget from the *lane-padded* footprint (E pads to 128 lanes).
    isz = lambda a: a.dtype.itemsize
    Epad = _round_up(E, 128)
    Spad = _round_up(S, 8)
    weight_bytes = (w1p.size * isz(w1p) + w2p.size * isz(w2p)
                    + 8 * Hp * isz(b1p) + 8 * Lp * isz(b2p))
    vmem_need = (2 * tm_eff * Spad * Epad * isz(xp)      # x tile, double-buffered
                 + 2 * tm_eff * Lp * isz(xp)             # out tile, double-buffered
                 + tm_eff * Kp * 4                       # pooled f32 scratch
                 + 2 * weight_bytes)                     # grid-invariant operands
    vmem_limit = int(min(max(2 * vmem_need, 32 * 1024 * 1024), 48 * 1024 * 1024))

    cost = pl.CostEstimate(
        flops=2 * Bp * (Kp * Hp + Hp * Lp) + 2 * Bp * S * E,
        transcendentals=Bp * (Hp + Lp),
        bytes_accessed=(xp.size * isz(xp) + w1p.size * isz(w1p)
                        + b1p.size * isz(b1p) + w2p.size * isz(w2p)
                        + b2p.size * isz(b2p) + Bp * Lp * isz(xp)),
    )

    out = pl.pallas_call(
        _fasttext_kernel,
        out_shape=jax.ShapeDtypeStruct((Bp, Lp), x.dtype),
        grid_spec=pltpu.PrefetchScalarGridSpec(
            num_scalar_prefetch=0,
            grid=grid,
            in_specs=[
                pl.BlockSpec((tm_eff, S, E), lambda i: (i, 0, 0)),
                # Grid-invariant operands: constant index_map => fetched once.
                pl.BlockSpec((Kp, Hp), lambda i: (0, 0)),
                pl.BlockSpec((1, Hp), lambda i: (0, 0)),
                pl.BlockSpec((Hp, Lp), lambda i: (0, 0)),
                pl.BlockSpec((1, Lp), lambda i: (0, 0)),
            ],
            out_specs=pl.BlockSpec((tm_eff, Lp), lambda i: (i, 0)),
            scratch_shapes=[pltpu.VMEM((tm_eff, Kp), jnp.float32)],
        ),
        compiler_params=pltpu.CompilerParams(
            dimension_semantics=("parallel",),
            vmem_limit_bytes=vmem_limit,
        ),
        cost_estimate=cost,
    )(xp, w1p, b1p, w2p, b2p)

    # Strip batch padding and padded label columns.
    return out[:B, :L]


def _reference(x, w1, b1, w2, b2):
    mx = jnp.max(x, axis=-1)
    av = jnp.mean(x, axis=-1)
    o = jnp.concatenate([mx, av], axis=-1)
    o = jnp.tanh(o @ w1 + b1)
    o = o @ w2 + b2
    return jax.nn.softmax(o, axis=-1)


if __name__ == "__main__":
    # FastText(embedding_size=32, seq_len=8, hidden_size=32, label_size=2)
    batch, seq_len, embedding_size = 4, 8, 32
    hidden_size, label_size = 32, 2

    key = jax.random.PRNGKey(0)
    kx, kw1, kb1, kw2, kb2 = jax.random.split(key, 5)

    x = jax.random.normal(kx, (batch, seq_len, embedding_size), dtype=jnp.float32)

    w1 = 0.1 * jax.random.normal(kw1, (2 * seq_len, hidden_size), dtype=jnp.float32)
    b1 = 0.01 * jax.random.normal(kb1, (hidden_size,), dtype=jnp.float32)
    w2 = 0.1 * jax.random.normal(kw2, (hidden_size, label_size), dtype=jnp.float32)
    b2 = 0.01 * jax.random.normal(kb2, (label_size,), dtype=jnp.float32)

    y = fasttext_forward(x, w1, b1, w2, b2)
    jax.block_until_ready(y)

    y_ref = _reference(x, w1, b1, w2, b2)
    assert y.shape == (batch, label_size)
    assert jnp.allclose(y, y_ref, atol=1e-4, rtol=1e-4), (
        f"max abs err = {jnp.max(jnp.abs(y - y_ref))}")

    print("KERNEL_OK")
</pallas_src>

<mosaic_0001>
module attributes {stable_mosaic.version = 11 : i64} {
  func.func @_fasttext_kernel(%arg0: i32, %arg1: memref<8x8x32xf32, #tpu.memory_space<vmem>>, %arg2: memref<256x128xf32, #tpu.memory_space<vmem>>, %arg3: memref<1x128xf32, #tpu.memory_space<vmem>>, %arg4: memref<128x128xf32, #tpu.memory_space<vmem>>, %arg5: memref<1x128xf32, #tpu.memory_space<vmem>>, %arg6: memref<8x128xf32, #tpu.memory_space<vmem>>, %arg7: memref<8x256xf32, #tpu.memory_space<vmem>>) attributes {dimension_semantics = [#tpu.dimension_semantics<parallel>], iteration_bounds = array<i64: 1>, scalar_prefetch = 0 : i64, scratch_operands = 1 : i64, tpu.core_type = #tpu.core_type<tc>, window_params = [{transform_indices = @transform_0, window_bounds = array<i64: 8, 8, 32>}, {pipeline_mode = #tpu.pipeline_mode<synchronous>, transform_indices = @transform_1, window_bounds = array<i64: 256, 128>}, {pipeline_mode = #tpu.pipeline_mode<synchronous>, transform_indices = @transform_2, window_bounds = array<i64: 1, 128>}, {pipeline_mode = #tpu.pipeline_mode<synchronous>, transform_indices = @transform_3, window_bounds = array<i64: 128, 128>}, {pipeline_mode = #tpu.pipeline_mode<synchronous>, transform_indices = @transform_4, window_bounds = array<i64: 1, 128>}, {transform_indices = @transform_5, window_bounds = array<i64: 8, 128>}]} {
    %c0 = arith.constant 0 : index
    %c0_0 = arith.constant 0 : index
    %c0_1 = arith.constant 0 : index
    %0 = vector.load %arg1[%c0, %c0_0, %c0_1] : memref<8x8x32xf32, #tpu.memory_space<vmem>>, vector<8x8x32xf32>
    %cst = arith.constant dense<0xFF800000> : vector<8x8xf32>
    %1 = vector.multi_reduction <maximumf>, %0, %cst [2] : vector<8x8x32xf32> to vector<8x8xf32>
    %cst_2 = arith.constant dense<0.000000e+00> : vector<8x8xf32>
    %2 = vector.multi_reduction <add>, %0, %cst_2 [2] : vector<8x8x32xf32> to vector<8x8xf32>
    %cst_3 = arith.constant 3.200000e+01 : f32
    %3 = vector.broadcast %cst_3 : f32 to vector<8x8xf32>
    %4 = arith.divf %2, %3 : vector<8x8xf32>
    %cst_4 = arith.constant 0.000000e+00 : f32
    %5 = vector.broadcast %cst_4 : f32 to vector<8x256xf32>
    %c0_5 = arith.constant 0 : index
    %c0_6 = arith.constant 0 : index
    %6 = vector.load %arg7[%c0_5, %c0_6] : memref<8x256xf32, #tpu.memory_space<vmem>>, vector<8x256xf32>
    tpu.vector_store %arg7[%c0_5, %c0_6], %5 {strides = array<i32>} : memref<8x256xf32, #tpu.memory_space<vmem>>, vector<8x256xf32>,
    %c0_7 = arith.constant 0 : index
    %c0_8 = arith.constant 0 : index
    %7 = vector.load %arg7[%c0_7, %c0_8] : memref<8x256xf32, #tpu.memory_space<vmem>>, vector<8x8xf32>
    tpu.vector_store %arg7[%c0_7, %c0_8], %1 {strides = array<i32>} : memref<8x256xf32, #tpu.memory_space<vmem>>, vector<8x8xf32>,
    %c0_9 = arith.constant 0 : index
    %c128 = arith.constant 128 : index
    %8 = vector.load %arg7[%c0_9, %c128] : memref<8x256xf32, #tpu.memory_space<vmem>>, vector<8x8xf32>
    tpu.vector_store %arg7[%c0_9, %c128], %4 {strides = array<i32>} : memref<8x256xf32, #tpu.memory_space<vmem>>, vector<8x8xf32>,
    %c0_10 = arith.constant 0 : index
    %c0_11 = arith.constant 0 : index
    %9 = vector.load %arg7[%c0_10, %c0_11] : memref<8x256xf32, #tpu.memory_space<vmem>>, vector<8x256xf32>
    %c0_12 = arith.constant 0 : index
    %c0_13 = arith.constant 0 : index
    %10 = vector.load %arg2[%c0_12, %c0_13] : memref<256x128xf32, #tpu.memory_space<vmem>>, vector<256x128xf32>
    %cst_14 = arith.constant dense<0.000000e+00> : vector<8x128xf32>
    %11 = tpu.matmul %9, %10, %cst_14 {dimension_numbers = #tpu.dot_dimension_numbers<[1], [0], [0], [1], [0, 0, 1, 1], [], []>} : vector<8x256xf32>, vector<256x128xf32>, vector<8x128xf32> -> vector<8x128xf32>
    %c0_15 = arith.constant 0 : index
    %c0_16 = arith.constant 0 : index
    %12 = vector.load %arg3[%c0_15, %c0_16] : memref<1x128xf32, #tpu.memory_space<vmem>>, vector<1x128xf32>
    %13 = vector.broadcast %12 : vector<1x128xf32> to vector<8x128xf32>
    %14 = arith.addf %11, %13 : vector<8x128xf32>
    %15 = math.tanh %14 : vector<8x128xf32>
    %c0_17 = arith.constant 0 : index
    %c0_18 = arith.constant 0 : index
    %16 = vector.load %arg4[%c0_17, %c0_18] : memref<128x128xf32, #tpu.memory_space<vmem>>, vector<128x128xf32>
    %cst_19 = arith.constant dense<0.000000e+00> : vector<8x128xf32>
    %17 = tpu.matmul %15, %16, %cst_19 {dimension_numbers = #tpu.dot_dimension_numbers<[1], [0], [0], [1], [0, 0, 1, 1], [], []>} : vector<8x128xf32>, vector<128x128xf32>, vector<8x128xf32> -> vector<8x128xf32>
    %c0_20 = arith.constant 0 : index
    %c0_21 = arith.constant 0 : index
    %18 = vector.load %arg5[%c0_20, %c0_21] : memref<1x128xf32, #tpu.memory_space<vmem>>, vector<1x128xf32>
    %19 = vector.broadcast %18 : vector<1x128xf32> to vector<8x128xf32>
    %20 = arith.addf %17, %19 : vector<8x128xf32>
    %cst_22 = arith.constant dense<0xFF800000> : vector<8xf32>
    %21 = vector.multi_reduction <maximumf>, %20, %cst_22 [1] : vector<8x128xf32> to vector<8xf32>
    %22 = vector.shape_cast %21 : vector<8xf32> to vector<8x1xf32>
    %23 = vector.broadcast %22 : vector<8x1xf32> to vector<8x128xf32>
    %24 = arith.subf %20, %23 : vector<8x128xf32>
    %25 = math.exp %24 : vector<8x128xf32>
    %cst_23 = arith.constant dense<0.000000e+00> : vector<8xf32>
    %26 = vector.multi_reduction <add>, %25, %cst_23 [1] : vector<8x128xf32> to vector<8xf32>
    %27 = vector.shape_cast %26 : vector<8xf32> to vector<8x1xf32>
    %28 = tpu.reciprocal %27 {approx = true} : vector<8x1xf32> -> vector<8x1xf32>
    %29 = arith.mulf %27, %28 : vector<8x1xf32>
    %cst_24 = arith.constant 2.000000e+00 : f32
    %30 = vector.broadcast %cst_24 : f32 to vector<8x1xf32>
    %31 = arith.subf %30, %29 : vector<8x1xf32>
    %32 = arith.mulf %28, %31 : vector<8x1xf32>
    %33 = vector.broadcast %32 : vector<8x1xf32> to vector<8x128xf32>
    %34 = arith.mulf %25, %33 : vector<8x128xf32>
    %c0_25 = arith.constant 0 : index
    %c0_26 = arith.constant 0 : index
    %35 = vector.load %arg6[%c0_25, %c0_26] : memref<8x128xf32, #tpu.memory_space<vmem>>, vector<8x128xf32>
    tpu.vector_store %arg6[%c0_25, %c0_26], %34 {strides = array<i32>} : memref<8x128xf32, #tpu.memory_space<vmem>>, vector<8x128xf32>,
    return
  }
  func.func @transform_0(%arg0: i32) -> (i32, i32, i32) {
    %c0_i32 = arith.constant 0 : i32
    %c0_i32_0 = arith.constant 0 : i32
    %c0_i32_1 = arith.constant 0 : i32
    return %arg0, %c0_i32, %c0_i32_0 : i32, i32, i32
  }
  func.func @transform_1(%arg0: i32) -> (i32, i32) {
    %c0_i32 = arith.constant 0 : i32
    %c0_i32_0 = arith.constant 0 : i32
    %c0_i32_1 = arith.constant 0 : i32
    return %c0_i32, %c0_i32_0 : i32, i32
  }
  func.func @transform_2(%arg0: i32) -> (i32, i32) {
    %c0_i32 = arith.constant 0 : i32
    %c0_i32_0 = arith.constant 0 : i32
    %c0_i32_1 = arith.constant 0 : i32
    return %c0_i32, %c0_i32_0 : i32, i32
  }
  func.func @transform_3(%arg0: i32) -> (i32, i32) {
    %c0_i32 = arith.constant 0 : i32
    %c0_i32_0 = arith.constant 0 : i32
    %c0_i32_1 = arith.constant 0 : i32
    return %c0_i32, %c0_i32_0 : i32, i32
  }
  func.func @transform_4(%arg0: i32) -> (i32, i32) {
    %c0_i32 = arith.constant 0 : i32
    %c0_i32_0 = arith.constant 0 : i32
    %c0_i32_1 = arith.constant 0 : i32
    return %c0_i32, %c0_i32_0 : i32, i32
  }
  func.func @transform_5(%arg0: i32) -> (i32, i32) {
    %c0_i32 = arith.constant 0 : i32
    %c0_i32_0 = arith.constant 0 : i32
    return %arg0, %c0_i32 : i32, i32
  }
}

</mosaic_0001>

<bundles_post_ra>
// kernel: fasttext_forward.1
= control target key start
LH: loop header
LB: loop body
LE: loop exit
PB: predicated region body
PF: predicated region fallthrough
CT: control target
= control target key end

     0   :  { %vm28_vm0 = vcmask 261120   ;;  %v572_v59 = vmov 0.0   ;;  %vm130_vm1 = vcmask 1041409   ;;  %vm132_vm2 = vcmask 1042434   ;;  %s823_s0 = inlined_call_operand.vmem [shape: f32[8,8,32], index: 0, kind: input, shape index: {}]   ;;  %s824_s1 = inlined_call_operand.vmem [shape: f32[256,128], index: 1, kind: input, shape index: {}]   ;;  %s825_s3 = inlined_call_operand.vmem [shape: f32[128,128], index: 3, kind: input, shape index: {}]   ;;  %s826_s2 = inlined_call_operand.vmem [shape: f32[1,128], index: 2, kind: input, shape index: {}]   ;;  %s827_s4 = inlined_call_operand.vmem [shape: f32[1,128], index: 4, kind: input, shape index: {}]   ;;  %s828_s5 = inlined_call_operand.vmem [shape: f32[8,128], index: 5, kind: output, shape index: {}]  }
   0x1   :  { %v22_v0 = vld [vmem:[%s823_s0 + $0x10] sm:$0xff]  ;;  %v20_v1 = vld [vmem:[%s823_s0] sm:$0xff]  ;;  %v23_v2 = vld [vmem:[%s823_s0 + $0x18] sm:$0xff]  ;;  %87 = vst [vmem:[#allocation2 + $0x8] sm:$0xff] %v572_v59  ;;  %vm134_vm3 = vcmask 1043459   ;;  %vm136_vm4 = vcmask 1044484  }
   0x2   :  { %v59_v3 = vsel %vm28_vm0, %v22_v0, 0.0  ;;  %v53_v4 = vsel %vm28_vm0, %v20_v1, 0.0  ;;  %v21_v5 = vld [vmem:[%s823_s0 + $0x8] sm:$0xff]  ;;  %v62_v6 = vsel %vm28_vm0, %v23_v2, 0.0  ;;  %v29_v9 = vsel %vm28_vm0, %v20_v1, -inf  ;;  %v24_v10 = vld [vmem:[%s823_s0 + $0x20] sm:$0xff] }
   0x3   :  { %60 = vadd.xlane.f32.xlu1 %v59_v3  ;;  %54 = vadd.xlane.f32.xlu0 %v53_v4  ;;  %v56_v7 = vsel %vm28_vm0, %v21_v5, 0.0  ;;  %v32_v8 = vsel %vm28_vm0, %v21_v5, -inf  ;;  %v35_v11 = vsel %vm28_vm0, %v22_v0, -inf  ;;  %v65_v12 = vsel %vm28_vm0, %v24_v10, 0.0  ;;  %v25_v13 = vld [vmem:[%s823_s0 + $0x28] sm:$0xff]  ;;  %v26_v16 = vld [vmem:[%s823_s0 + $0x30] sm:$0xff] }
   0x4   :  { %v38_v14 = vsel %vm28_vm0, %v23_v2, -inf  ;;  %v68_v15 = vsel %vm28_vm0, %v25_v13, 0.0  ;;  %v41_v17 = vsel %vm28_vm0, %v24_v10, -inf  ;;  %v71_v18 = vsel %vm28_vm0, %v26_v16, 0.0  ;;  %v27_v19 = vld [vmem:[%s823_s0 + $0x38] sm:$0xff]  ;;  %v214_v20 = vld [vmem:[%s824_s1 + $0x80] sm:$0xff] }
   0x5   :  { %v215_v21 = vld [vmem:[%s824_s1 + $0x88] sm:$0xff]  ;;  %v198_v23 = vld [vmem:[%s824_s1] sm:$0xff]  ;;  %v44_v25 = vsel %vm28_vm0, %v25_v13, -inf  ;;  %v74_v26 = vsel %vm28_vm0, %v27_v19, 0.0  ;;  %v216_v28 = vld [vmem:[%s824_s1 + $0x90] sm:$0xff]  ;;  %v47_v33 = vsel %vm28_vm0, %v26_v16, -inf }
   0x6   :  { %v507_v22 = vpack.c.bf16 %v215_v21, %v214_v20  ;;  %v199_v24 = vld [vmem:[%s824_s1 + $0x8] sm:$0xff]  ;;  %v217_v29 = vld [vmem:[%s824_s1 + $0x98] sm:$0xff]  ;;  %v200_v31 = vld [vmem:[%s824_s1 + $0x10] sm:$0xff]  ;;  %v50_v34 = vsel %vm28_vm0, %v27_v19, -inf  ;;  %86 = vst [vmem:[#allocation2] sm:$0xff] %v572_v59  ;;  %vm138_vm5 = vcmask 1045509  }
   0x7   :  { %63 = vadd.xlane.f32.xlu1 %v62_v6  ;;  %57 = vadd.xlane.f32.xlu0 %v56_v7  ;;  %v509_v27 = vpack.c.bf16 %v199_v24, %v198_v23  ;;  %v511_v30 = vpack.c.bf16 %v217_v29, %v216_v28  ;;  %v201_v32 = vld [vmem:[%s824_s1 + $0x18] sm:$0xff]  ;;  %v218_v36 = vld [vmem:[%s824_s1 + $0xa0] sm:$0xff]  ;;  %v219_v37 = vld [vmem:[%s824_s1 + $0xa8] sm:$0xff]  ;;  %vm140_vm6 = vcmask 1046534   ;;  %vm142_vm7 = vcmask 1047559  }
   0x8   :  { %508 = vmatprep.subr.bf16.mxu0 %v507_v22  ;;  %v513_v35 = vpack.c.bf16 %v201_v32, %v200_v31  ;;  %v515_v38 = vpack.c.bf16 %v219_v37, %v218_v36  ;;  %v202_v39 = vld [vmem:[%s824_s1 + $0x20] sm:$0xff]  ;;  %v203_v40 = vld [vmem:[%s824_s1 + $0x28] sm:$0xff]  ;;  %v220_v42 = vld [vmem:[%s824_s1 + $0xb0] sm:$0xff]  ;;  %vm145_vm8 = vcmask 64512   ;;  %vm574_vm9 = vmmov 0  }
   0x9   :  { %510 = vmatpush3.bf16.msra.mxu0 %v509_v27  ;;  %v517_v41 = vpack.c.bf16 %v203_v40, %v202_v39  ;;  %v221_v43 = vld [vmem:[%s824_s1 + $0xb8] sm:$0xff]  ;;  %v204_v45 = vld [vmem:[%s824_s1 + $0x30] sm:$0xff]  ;;  %v222_v48 = vld [vmem:[%s824_s1 + $0xc0] sm:$0xff]  ;;  %504 = vmatprep.mubr.msk.f32.mxu1 %vm574_vm9, %v572_v59 }
   0xa   :  { %512 = vmatprep.subr.bf16.mxu0 %v511_v30  ;;  %v519_v44 = vpack.c.bf16 %v221_v43, %v220_v42  ;;  %v205_v46 = vld [vmem:[%s824_s1 + $0x38] sm:$0xff]  ;;  %v223_v49 = vld [vmem:[%s824_s1 + $0xc8] sm:$0xff]  ;;  %v206_v51 = vld [vmem:[%s824_s1 + $0x40] sm:$0xff] }
   0xb   :  { %33 = vmax.xlane.f32.xlu1 %v32_v8  ;;  %30 = vmax.xlane.f32.xlu0 %v29_v9  ;;  %v521_v47 = vpack.c.bf16 %v205_v46, %v204_v45  ;;  %v523_v50 = vpack.c.bf16 %v223_v49, %v222_v48  ;;  %v207_v52 = vld [vmem:[%s824_s1 + $0x48] sm:$0xff]  ;;  %v224_v54 = vld [vmem:[%s824_s1 + $0xd0] sm:$0xff]  ;;  %v225_v55 = vld [vmem:[%s824_s1 + $0xd8] sm:$0xff]  ;;  %v573_v9 = vmov 0.0|0.0  }
   0xc   :  { %v525_v53 = vpack.c.bf16 %v207_v52, %v206_v51  ;;  %v527_v56 = vpack.c.bf16 %v225_v55, %v224_v54  ;;  %v208_v57 = vld [vmem:[%s824_s1 + $0x50] sm:$0xff]  ;;  %v209_v58 = vld [vmem:[%s824_s1 + $0x58] sm:$0xff]  ;;  %v226_v61 = vld [vmem:[%s824_s1 + $0xe0] sm:$0xff]  ;;  %539 = vmatprep.subr.bf16.mxu1 %v573_v9 }
   0xd   :  { %514 = vmatpush3.bf16.msra.mxu0 %v513_v35  ;;  %v529_v60 = vpack.c.bf16 %v209_v58, %v208_v57  ;;  %v227_v62 = vld [vmem:[%s824_s1 + $0xe8] sm:$0xff]  ;;  %v210_v0 = vld [vmem:[%s824_s1 + $0x60] sm:$0xff]  ;;  %v228_v3 = vld [vmem:[%s824_s1 + $0xf0] sm:$0xff] }
   0xe   :  { %516 = vmatprep.subr.bf16.mxu0 %v515_v38  ;;  %v531_v63 = vpack.c.bf16 %v227_v62, %v226_v61  ;;  %v211_v1 = vld [vmem:[%s824_s1 + $0x68] sm:$0xff]  ;;  %v229_v4 = vld [vmem:[%s824_s1 + $0xf8] sm:$0xff]  ;;  %v212_v5 = vld [vmem:[%s824_s1 + $0x70] sm:$0xff] }
   0xf   :  { %36 = vmax.xlane.f32.xlu1 %v35_v11  ;;  %66 = vadd.xlane.f32.xlu0 %v65_v12  ;;  %v533_v2 = vpack.c.bf16 %v211_v1, %v210_v0  ;;  %v535_v6 = vpack.c.bf16 %v229_v4, %v228_v3  ;;  %v213_v7 = vld [vmem:[%s824_s1 + $0x78] sm:$0xff]  ;;  %v308_v10 = vld [vmem:[%s825_s3] sm:$0xff]  ;;  %v309_v11 = vld [vmem:[%s825_s3 + $0x8] sm:$0xff] }
  0x10   :  { %v537_v8 = vpack.c.bf16 %v213_v7, %v212_v5  ;;  %v310_v12 = vld [vmem:[%s825_s3 + $0x10] sm:$0xff]  ;;  %v540_v13 = vpack.c.bf16 %v309_v11, %v308_v10  ;;  %v312_v16 = vld [vmem:[%s825_s3 + $0x20] sm:$0xff]  ;;  %v315_v20 = vld [vmem:[%s825_s3 + $0x38] sm:$0xff] }
  0x11   :  { %518 = vmatpush3.bf16.msra.mxu0 %v517_v41  ;;  %v314_v19 = vld [vmem:[%s825_s3 + $0x30] sm:$0xff]  ;;  %v419_v59 = vld [vmem:[%s827_s4] ss:$0 sm:$0xff] }
  0x12   :  { %520 = vmatprep.subr.bf16.mxu0 %v519_v44  ;;  %541 = vmatpush3.bf16.msra.mxu1 %v540_v13  ;;  %v549_v21 = vpack.c.bf16 %v315_v20, %v314_v19  ;;  %v316_v20 = vld [vmem:[%s825_s3 + $0x40] sm:$0xff] }
  0x13   :  { %39 = vmax.xlane.f32.xlu1 %v38_v14  ;;  %69 = vadd.xlane.f32.xlu0 %v68_v15  ;;  %v311_v14 = vld [vmem:[%s825_s3 + $0x18] sm:$0xff] }
  0x14   :  { %v543_v15 = vpack.c.bf16 %v311_v14, %v310_v12  ;;  %542 = vmatprep.subr.bf16.mxu1 %v573_v9 }
  0x15   :  { %522 = vmatpush3.bf16.msra.mxu0 %v521_v47 }
  0x16   :  { %524 = vmatprep.subr.bf16.mxu0 %v523_v50  ;;  %544 = vmatpush3.bf16.msra.mxu1 %v543_v15 }
  0x17   :  { %42 = vmax.xlane.f32.xlu1 %v41_v17  ;;  %72 = vadd.xlane.f32.xlu0 %v71_v18  ;;  %v313_v17 = vld [vmem:[%s825_s3 + $0x28] sm:$0xff] }
  0x18   :  { %v546_v18 = vpack.c.bf16 %v313_v17, %v312_v16  ;;  %545 = vmatprep.subr.bf16.mxu1 %v573_v9 }
  0x19   :  { %526 = vmatpush3.bf16.msra.mxu0 %v525_v53 }
  0x1a   :  { %528 = vmatprep.subr.bf16.mxu0 %v527_v56  ;;  %547 = vmatpush3.bf16.msra.mxu1 %v546_v18 }
  0x1b   :  { %45 = vmax.xlane.f32.xlu1 %v44_v25  ;;  %75 = vadd.xlane.f32.xlu0 %v74_v26  ;;  %v96_v26 = vlaneseq }
  0x1c   :  { %548 = vmatprep.subr.bf16.mxu1 %v573_v9 }
  0x1d   :  { %530 = vmatpush3.bf16.msra.mxu0 %v529_v60  ;;  %v97_v29 = vand.u32 127, %v96_v26  ;;  %v99_v30 = vshrl.u32 %v96_v26, 7  ;;  %v320_v26 = vld [vmem:[%s825_s3 + $0x60] sm:$0xff] }
  0x1e   :  { %532 = vmatprep.subr.bf16.mxu0 %v531_v63  ;;  %550 = vmatpush3.bf16.msra.mxu1 %v549_v21  ;;  %v317_v21 = vld [vmem:[%s825_s3 + $0x48] sm:$0xff] }
  0x1f   :  { %48 = vmax.xlane.f32.xlu0 %v47_v33  ;;  %51 = vmax.xlane.f32.xlu1 %v50_v34  ;;  %v100_v34 = vsub.s32 %v97_v29, %v99_v30  ;;  %v322_v29 = vld [vmem:[%s825_s3 + $0x70] sm:$0xff]  ;;  %v323_v30 = vld [vmem:[%s825_s3 + $0x78] sm:$0xff] }
  0x20   :  { %551 = vmatprep.subr.bf16.mxu1 %v573_v9 }
  0x21   :  { %534 = vmatpush3.bf16.msra.mxu0 %v533_v2 }
  0x22   :  { %536 = vmatprep.subr.bf16.mxu0 %v535_v6 }
  0x25   :  { %538 = vmatpush3.bf16.msra.mxu0 %v537_v8 }
  0x90   :  { %v61_v22 = vpop.xlane.xlu1 %60  ;;  %v55_v23 = vpop.xlane.xlu0 %54 }
  0x91   :  { %v78_v35 = vmul.f32 0.03125, %v55_v23  ;;  %v80_v37 = vmul.f32 0.03125, %v61_v22  ;;  %v552_v22 = vpack.c.bf16 %v317_v21, %v316_v20  ;;  %v318_v23 = vld [vmem:[%s825_s3 + $0x50] sm:$0xff] }
  0x93   :  { %v158_v40 = vrot.slane %v78_v35, %v100_v34  ;;  %v166_v45 = vrot.slane %v80_v37, %v100_v34  ;;  %553 = vmatpush3.bf16.msra.mxu1 %v552_v22 }
  0x94   :  { %v64_v24 = vpop.xlane.xlu1 %63  ;;  %v58_v25 = vpop.xlane.xlu0 %57  ;;  %554 = vmatprep.subr.bf16.mxu1 %v573_v9 }
  0x95   :  { %v79_v31 = vmul.f32 0.03125, %v58_v25  ;;  %v81_v41 = vmul.f32 0.03125, %v64_v24  ;;  %v319_v24 = vld [vmem:[%s825_s3 + $0x58] sm:$0xff] }
  0x96   :  { %v555_v25 = vpack.c.bf16 %v319_v24, %v318_v23 }
  0x97   :  { %v162_v36 = vrot.slane %v79_v31, %v100_v34  ;;  %v170_v48 = vrot.slane %v81_v41, %v100_v34  ;;  %v561_v31 = vpack.c.bf16 %v323_v30, %v322_v29 }
  0x98   :  { %v34_v27 = vpop.xlane.xlu1 %33  ;;  %v31_v28 = vpop.xlane.xlu0 %30  ;;  %556 = vmatpush3.bf16.msra.mxu1 %v555_v25 }
  0x99   :  { %v187_v43 = vsel %vm130_vm1, %v162_v36, %v158_v40  ;;  %v105_v50 = vrot.slane %v34_v27, %v100_v34  ;;  %v101_v51 = vrot.slane %v31_v28, %v100_v34  ;;  %v321_v27 = vld [vmem:[%s825_s3 + $0x68] sm:$0xff]  ;;  %557 = vmatprep.subr.bf16.mxu1 %v573_v9 }
  0x9a   :  { %v188_v52 = vsel %vm132_vm2, %v166_v45, %v187_v43  ;;  %v558_v28 = vpack.c.bf16 %v321_v27, %v320_v26 }
  0x9b   :  { %v189_v61 = vsel %vm134_vm3, %v170_v48, %v188_v52  ;;  %v131_v0 = vsel %vm130_vm1, %v105_v50, %v101_v51 }
  0x9c   :  { %v37_v32 = vpop.xlane.xlu1 %36  ;;  %v67_v33 = vpop.xlane.xlu0 %66  ;;  %559 = vmatpush3.bf16.msra.mxu1 %v558_v28 }
  0x9d   :  { %v82_v42 = vmul.f32 0.03125, %v67_v33  ;;  %v109_v54 = vrot.slane %v37_v32, %v100_v34  ;;  %560 = vmatprep.subr.bf16.mxu1 %v573_v9  ;;  %v418_v33 = vld [vmem:[%s826_s2] ss:$0 sm:$0xff] }
  0x9f   :  { %v174_v53 = vrot.slane %v82_v42, %v100_v34  ;;  %v133_v3 = vsel %vm132_vm2, %v109_v54, %v131_v0 }
  0xa0   :  { %v40_v38 = vpop.xlane.xlu1 %39  ;;  %v70_v39 = vpop.xlane.xlu0 %69  ;;  %562 = vmatpush3.bf16.msra.mxu1 %v561_v31 }
  0xa1   :  { %v83_v44 = vmul.f32 0.03125, %v70_v39  ;;  %v113_v56 = vrot.slane %v40_v38, %v100_v34  ;;  %v190_v1 = vsel %vm136_vm4, %v174_v53, %v189_v61 }
  0xa3   :  { %v178_v55 = vrot.slane %v83_v44, %v100_v34  ;;  %v135_v6 = vsel %vm134_vm3, %v113_v56, %v133_v3 }
  0xa4   :  { %v43_v46 = vpop.xlane.xlu1 %42  ;;  %v73_v47 = vpop.xlane.xlu0 %72 }
  0xa5   :  { %v84_v49 = vmul.f32 0.03125, %v73_v47  ;;  %v117_v62 = vrot.slane %v43_v46, %v100_v34  ;;  %v191_v4 = vsel %vm138_vm5, %v178_v55, %v190_v1 }
  0xa7   :  { %v182_v57 = vrot.slane %v84_v49, %v100_v34  ;;  %v137_v11 = vsel %vm136_vm4, %v117_v62, %v135_v6 }
  0xa8   :  { %v46_v58 = vpop.xlane.xlu1 %45  ;;  %v76_v60 = vpop.xlane.xlu0 %75 }
  0xa9   :  { %v85_v63 = vmul.f32 0.03125, %v76_v60  ;;  %v121_v2 = vrot.slane %v46_v58, %v100_v34  ;;  %v192_v7 = vsel %vm140_vm6, %v182_v57, %v191_v4 }
  0xab   :  { %v186_v5 = vrot.slane %v85_v63, %v100_v34  ;;  %v139_v15 = vsel %vm138_vm5, %v121_v2, %v137_v11 }
  0xac   :  { %v49_v8 = vpop.xlane.xlu0 %48  ;;  %v52_v10 = vpop.xlane.xlu1 %51 }
  0xad   :  { %v193_v12 = vsel %vm142_vm7, %v186_v5, %v192_v7  ;;  %v125_v13 = vrot.slane %v49_v8, %v100_v34  ;;  %v129_v14 = vrot.slane %v52_v10, %v100_v34 }
  0xae   :  { %195 = vst.msk [vmem:[#allocation2 + $0x8] sm:$0xff] %vm145_vm8, %v193_v12 }
  0xaf   :  { %v141_v16 = vsel %vm140_vm6, %v125_v13, %v139_v15 }
  0xb0   :  { %v143_v17 = vsel %vm142_vm7, %v129_v14, %v141_v16 }
  0xb1   :  { %146 = vst.msk [vmem:[#allocation2] sm:$0xff] %vm145_vm8, %v143_v17 }
  0xb5   :  { %v197_v18 = vld [vmem:[#allocation2 + $0x8] sm:$0xff] }
  0xb6   :  { %301 = vmatprep.mubr.f32.mxu0 %v197_v18 }
  0xb8   :  { %v196_v19 = vld [vmem:[#allocation2] sm:$0xff] }
  0xb9   :  { %302 = vmatmul.mubr.f32.vlgmr.msra.gmra.mrb[0].mxu0 %v196_v19 }
 0x18c   :  { %v452_v32 = vpop.f32.mrb[0].mxu0 }
 0x18d   :  { %v453_v34 = vpop.f32.mrb[1].mxu0 }
 0x18e   :  { %v454_v35 = vadd.f32 %v453_v34, %v452_v32 }
 0x190   :  { %v304_v36 = vadd.f32 %v454_v35, %v418_v33 }
 0x192   :  { %566 = vtanh.f32 %v304_v36 }
 0x19c   :  { %v567_v37 = vpop.eup %566 }
 0x19d   :  { %505 = vmatmul.mubr.f32.vlgmr.msra.gmra.mrb[0].mxu1 %v567_v37 }
 0x270   :  { %v397_v38 = vpop.f32.mrb[0].mxu1 }
 0x271   :  { %v398_v39 = vadd.f32 %v419_v59, %v397_v38  ;;  %v506_v40 = vpop.f32.mrb[1].mxu1 }
 0x273   :  { %401 = vmax.xlane.f32.xlu0 %v398_v39 }
 0x300   :  { %v402_v9 = vpop.xlane.xlu0 %401 }
 0x301   :  { %v403_v41 = vsub.f32 %v398_v39, %v402_v9 }
 0x303   :  { %v404_v42 = vmul.f32 1.442695, %v403_v41 }
 0x305   :  { %568 = vpow2.f32 %v404_v42 }
 0x30f   :  { %v569_v43 = vpop.eup %568 }
 0x310   :  { %406 = vadd.xlane.f32.xlu1 %v569_v43 }
 0x39d   :  { %v407_v44 = vpop.xlane.xlu1 %406 }
 0x39e   :  { %570 = vrcp.f32 %v407_v44 }
 0x3a8   :  { %v571_v45 = vpop.eup %570 }
 0x3a9   :  { %v409_v46 = vmul.f32 %v571_v45, %v407_v44 }
 0x3ab   :  { %v410_v47 = vsub.f32 2.0, %v409_v46 }
 0x3ad   :  { %v411_v48 = vmul.f32 %v571_v45, %v410_v47 }
 0x3af   :  { %v412_v49 = vmul.f32 %v569_v43, %v411_v48 }
 0x3b1   :  { %413 = vst [vmem:[%s828_s5] sm:$0xff] %v412_v49 }

</bundles_post_ra>
